<compile_context>
chip_gen: v7x
topology: tpu7x:2x2x1
jax: 0.10.0
libtpu: 0.0.40
codegen_flags: <defaults>
</compile_context>

<pallas_src>
import functools

import jax
import jax.numpy as jnp
from jax import lax
from jax.experimental import pallas as pl
from jax.experimental.pallas import tpu as pltpu


# ----------------------------------------------------------------------------
# Pallas kernels
# ----------------------------------------------------------------------------
def _matmul_bias_act_kernel(a_ref, b_ref, bias_ref, o_ref, *, relu):
    """o = act(a @ b + bias).  a:(tm,K) b:(K,N) bias:(1,N)."""
    acc = jnp.dot(a_ref[...], b_ref[...], preferred_element_type=jnp.float32)
    acc = acc + bias_ref[...]
    if relu:
        acc = jnp.maximum(acc, 0.0)
    o_ref[...] = acc


def _layer1_fused_kernel(*refs, H, W):
    """Fused ResNet-50 layer1 (3 bottlenecks, folded BN) + global average pool.

    refs = (x_ref,
            w1_0,b1_0,w2_0,b2_0,w3_0,b3_0,wd_0,bd_0,   # block 0 (with downsample)
            w1_1,b1_1,w2_1,b2_1,w3_1,b3_1,             # block 1
            w1_2,b1_2,w2_2,b2_2,w3_2,b3_2,             # block 2
            o_ref)
    x_ref  : (1, H*W, Cin)  one image, rows ordered (h, w)
    w2_*   : (9, C, C)      per-tap 3x3 weight matrices, tap k = (dh+1)*3 + (dw+1)
    o_ref  : (1, 1, 256)    pooled features for this image
    """
    x_ref = refs[0]
    o_ref = refs[-1]
    w = refs[1:-1]
    HW = H * W

    def conv3x3_relu(t, w2_ref, b2_ref):
        # t: (HW, C). 3x3, stride 1, pad 1 conv via 9 roll+mask taps, all VMEM-resident.
        c_out = w2_ref.shape[2]
        r = lax.broadcasted_iota(jnp.int32, t.shape, 0)
        hh = r // W
        ww = r % W
        acc = jnp.zeros((t.shape[0], c_out), jnp.float32)
        for dh in (-1, 0, 1):
            for dw in (-1, 0, 1):
                k = (dh + 1) * 3 + (dw + 1)
                shift = (-(dh * W + dw)) % HW
                shifted = jnp.roll(t, shift, axis=0)
                valid = ((hh + dh >= 0) & (hh + dh < H) &
                         (ww + dw >= 0) & (ww + dw < W))
                tap = jnp.where(valid, shifted, 0.0)
                acc = acc + jnp.dot(tap, w2_ref[k],
                                    preferred_element_type=jnp.float32)
        return jnp.maximum(acc + b2_ref[...], 0.0)

    def bottleneck(t_in, w1, b1, w2, b2, w3, b3, skip):
        t1 = jnp.maximum(
            jnp.dot(t_in, w1[...], preferred_element_type=jnp.float32) + b1[...],
            0.0)
        t2 = conv3x3_relu(t1, w2, b2)
        t3 = jnp.dot(t2, w3[...], preferred_element_type=jnp.float32) + b3[...]
        # residual add + ReLU fused in the conv3 epilogue
        return jnp.maximum(t3 + skip, 0.0)

    x = x_ref[0]                                    # (HW, Cin)

    # block 0: 1x1 downsample on the skip path
    (w1_0, b1_0, w2_0, b2_0, w3_0, b3_0, wd_0, bd_0) = w[0:8]
    skip0 = jnp.dot(x, wd_0[...], preferred_element_type=jnp.float32) + bd_0[...]
    y = bottleneck(x, w1_0, b1_0, w2_0, b2_0, w3_0, b3_0, skip0)

    # blocks 1, 2: identity skip
    (w1_1, b1_1, w2_1, b2_1, w3_1, b3_1) = w[8:14]
    y = bottleneck(y, w1_1, b1_1, w2_1, b2_1, w3_1, b3_1, y)
    (w1_2, b1_2, w2_2, b2_2, w3_2, b3_2) = w[14:20]
    y = bottleneck(y, w1_2, b1_2, w2_2, b2_2, w3_2, b3_2, y)

    # fused global average pool over the spatial rows
    o_ref[0] = jnp.mean(y, axis=0, keepdims=True)   # (1, 256)


def _head_kernel(hid_ref, w_ref, b_ref, y_ref, logit_ref, loss_ref, pred_ref):
    """fc(256->1) as a VPU reduce + BCEWithLogits(mean) + sigmoid."""
    hidden = hid_ref[...]                           # (B, C)
    w_row = w_ref[...]                              # (1, C)
    z = jnp.sum(hidden * w_row, axis=-1, keepdims=True) + b_ref[...]   # (B, 1)
    logit_ref[...] = z
    y = y_ref[...]                                  # (B, 1) float labels
    # numerically-stable BCEWithLogits, mean reduction
    l = jnp.maximum(z, 0.0) - z * y + jnp.log(1.0 + jnp.exp(-jnp.abs(z)))
    loss_ref[...] = jnp.mean(l, keepdims=True)      # (1, 1)
    pred_ref[...] = 1.0 / (1.0 + jnp.exp(-z))       # sigmoid


# ----------------------------------------------------------------------------
# Pallas wrappers
# ----------------------------------------------------------------------------
def pallas_matmul_bias_act(a, b, bias, relu):
    """a:(M,K) @ b:(K,N) + bias:(1,N), optional ReLU. 2 parallel M-steps when big enough."""
    M, K = a.shape
    N = b.shape[1]
    if M >= 256 and M % 16 == 0:
        grid_m, tm = 2, M // 2      # >=2 parallel steps -> both v7x TensorCores busy
    else:
        grid_m, tm = 1, M
    kernel = functools.partial(_matmul_bias_act_kernel, relu=relu)
    return pl.pallas_call(
        kernel,
        out_shape=jax.ShapeDtypeStruct((M, N), jnp.float32),
        grid=(grid_m,),
        in_specs=[pl.BlockSpec((tm, K), lambda i: (i, 0)),
                  pl.BlockSpec((K, N), lambda i: (0, 0)),
                  pl.BlockSpec((1, N), lambda i: (0, 0))],
        out_specs=pl.BlockSpec((tm, N), lambda i: (i, 0)),
        compiler_params=pltpu.CompilerParams(dimension_semantics=("parallel",)),
    )(a, b, bias)


def _const_index_map(ndim):
    return lambda i: (0,) * ndim


def pallas_layer1(x_bhwc, blocks):
    """x: (B, H, W, 64) NHWC. Returns pooled features (B, 256). One fused pallas_call."""
    B, H, W, C = x_bhwc.shape
    HW = H * W
    x = x_bhwc.reshape(B, HW, C)
    b0, b1, b2 = blocks
    weight_args = [b0['w1'], b0['b1'], b0['w2'], b0['b2'], b0['w3'], b0['b3'],
                   b0['wd'], b0['bd'],
                   b1['w1'], b1['b1'], b1['w2'], b1['b2'], b1['w3'], b1['b3'],
                   b2['w1'], b2['b1'], b2['w2'], b2['b2'], b2['w3'], b2['b3']]
    in_specs = [pl.BlockSpec((1, HW, C), lambda i: (i, 0, 0))]
    for wa in weight_args:
        in_specs.append(pl.BlockSpec(wa.shape, _const_index_map(wa.ndim)))
    Cout = b0['w3'].shape[1]
    out = pl.pallas_call(
        functools.partial(_layer1_fused_kernel, H=H, W=W),
        out_shape=jax.ShapeDtypeStruct((B, 1, Cout), jnp.float32),
        grid=(B,),
        in_specs=in_specs,
        out_specs=pl.BlockSpec((1, 1, Cout), lambda i: (i, 0, 0)),
        compiler_params=pltpu.CompilerParams(dimension_semantics=("parallel",)),
    )(x, *weight_args)
    return out.reshape(B, Cout)


def pallas_head(hidden, fc_w_row, fc_b, label):
    """hidden:(B,C), fc_w_row:(1,C), fc_b:(1,1), label:(B,)."""
    B, C = hidden.shape
    y = label.reshape(B, 1).astype(jnp.float32)
    return pl.pallas_call(
        _head_kernel,
        out_shape=(jax.ShapeDtypeStruct((B, 1), jnp.float32),
                   jax.ShapeDtypeStruct((1, 1), jnp.float32),
                   jax.ShapeDtypeStruct((B, 1), jnp.float32)),
        grid=(1,),
        in_specs=[pl.BlockSpec((B, C), lambda i: (0, 0)),
                  pl.BlockSpec((1, C), lambda i: (0, 0)),
                  pl.BlockSpec((1, 1), lambda i: (0, 0)),
                  pl.BlockSpec((B, 1), lambda i: (0, 0))],
        out_specs=(pl.BlockSpec((B, 1), lambda i: (0, 0)),
                   pl.BlockSpec((1, 1), lambda i: (0, 0)),
                   pl.BlockSpec((B, 1), lambda i: (0, 0))),
    )(hidden, fc_w_row, fc_b, y)


# ----------------------------------------------------------------------------
# JAX glue: NPR residual, im2col (conv1 only), maxpool, parameter prep
# ----------------------------------------------------------------------------
def npr_residual(x):
    """x NCHW. out = (x - up2x(down2x_nearest(x))) * 2/3 (tiny elementwise glue)."""
    B, C, H, W = x.shape
    assert H % 2 == 0 and W % 2 == 0, "NPR residual requires even H and W"
    blk = x[:, :, ::2, ::2]
    blk = jnp.repeat(jnp.repeat(blk, 2, axis=2), 2, axis=3)
    return (x - blk) * (2.0 / 3.0)


def im2col(x, kh, kw, stride, pad):
    """x: NHWC -> patches (B, Ho, Wo, kh*kw*C), ordering (kh, kw, C) fastest=C."""
    B, H, W, C = x.shape
    xp = jnp.pad(x, ((0, 0), (pad, pad), (pad, pad), (0, 0)))
    Ho = (H + 2 * pad - kh) // stride + 1
    Wo = (W + 2 * pad - kw) // stride + 1
    cols = []
    for dh in range(kh):
        for dw in range(kw):
            cols.append(xp[:, dh:dh + stride * Ho:stride, dw:dw + stride * Wo:stride, :])
    return jnp.concatenate(cols, axis=-1), Ho, Wo


def maxpool_3x3_s2_p1(x):  # NHWC
    return lax.reduce_window(x, -jnp.inf, lax.max,
                             window_dimensions=(1, 3, 3, 1),
                             window_strides=(1, 2, 2, 1),
                             padding=((0, 0), (1, 1), (1, 1), (0, 0)))


def fold_bn(w, bn, eps=1e-5):
    scale = bn['gamma'] / jnp.sqrt(bn['var'] + eps)
    w_f = w * scale[:, None, None, None]
    b_f = bn['beta'] - bn['mean'] * scale
    return w_f, b_f


def _conv_matrix(w):  # (Cout, Cin, kh, kw) -> (kh*kw*Cin, Cout)
    Cout, Cin, kh, kw = w.shape
    return jnp.transpose(w, (2, 3, 1, 0)).reshape(kh * kw * Cin, Cout)


def prepare_params(raw):
    """Fold BN and pre-layout all weight matrices ONCE (kernels get final layouts)."""
    prep = {}
    w1, b1 = fold_bn(raw['conv1'], raw['bn1'])
    prep['conv1_w'] = _conv_matrix(w1)                  # (147, 64)
    prep['conv1_b'] = b1.reshape(1, -1)                 # (1, 64)

    blocks = []
    for blk in raw['layer1']:
        w1f, b1f = fold_bn(blk['conv1'], blk['bn1'])
        w2f, b2f = fold_bn(blk['conv2'], blk['bn2'])
        w3f, b3f = fold_bn(blk['conv3'], blk['bn3'])
        cout2, cin2 = w2f.shape[0], w2f.shape[1]
        d = {'w1': _conv_matrix(w1f), 'b1': b1f.reshape(1, -1),
             'w2': jnp.transpose(w2f, (2, 3, 1, 0)).reshape(9, cin2, cout2),
             'b2': b2f.reshape(1, -1),
             'w3': _conv_matrix(w3f), 'b3': b3f.reshape(1, -1)}
        if 'down' in blk:
            wdf, bdf = fold_bn(blk['down'], blk['bnd'])
            d['wd'] = _conv_matrix(wdf)
            d['bd'] = bdf.reshape(1, -1)
        blocks.append(d)
    prep['layer1'] = blocks

    prep['fc_w_row'] = raw['fc_w'].reshape(1, -1)       # (1, 256)
    prep['fc_b'] = raw['fc_b'].reshape(1, 1)            # (1, 1)
    return prep


# ----------------------------------------------------------------------------
# Model forward (mirrors NPRModel.forward)
# ----------------------------------------------------------------------------
def npr_model_forward(params, image, label=None):
    """image: (B, 3, H, W) float32 NCHW. params: output of prepare_params()."""
    x = npr_residual(image.astype(jnp.float32))          # NPR front-end (+ 2/3 scale)
    x = jnp.transpose(x, (0, 2, 3, 1))                   # -> NHWC

    # conv1 7x7/2 pad3 + folded BN + ReLU : one Pallas GEMM with fused epilogue
    B = x.shape[0]
    patches, Ho, Wo = im2col(x, 7, 7, stride=2, pad=3)
    A = patches.reshape(B * Ho * Wo, -1)
    cout = params['conv1_w'].shape[1]
    x = pallas_matmul_bias_act(A, params['conv1_w'], params['conv1_b'],
                               relu=True).reshape(B, Ho, Wo, cout)

    # maxpool 3x3/2 pad1
    x = maxpool_3x3_s2_p1(x)

    # layer1 (3 bottlenecks) + global avg-pool : single fused Pallas call
    hidden = pallas_layer1(x, params['layer1'])          # (B, 256)

    if label is None:
        return hidden

    logits, loss, pred = pallas_head(hidden, params['fc_w_row'], params['fc_b'], label)
    loss_s = loss[0, 0]
    return {'backward_loss': loss_s,
            'pred_mask': None,
            'pred_label': pred.reshape(-1),
            'visual_loss': {'predict_loss': loss_s},
            'visual_image': {}}


# ----------------------------------------------------------------------------
# Deterministic parameter init (shapes from NPR resnet50 truncated backbone)
# ----------------------------------------------------------------------------
def init_params(key):
    keys = iter(jax.random.split(key, 128))

    def conv_w(cout, cin, kh, kw):
        fan_in = cin * kh * kw
        return jax.random.normal(next(keys), (cout, cin, kh, kw), jnp.float32) * (2.0 / fan_in) ** 0.5

    def bn_p(c):
        return {'gamma': 1.0 + 0.1 * jax.random.normal(next(keys), (c,), jnp.float32),
                'beta': 0.05 * jax.random.normal(next(keys), (c,), jnp.float32),
                'mean': 0.05 * jax.random.normal(next(keys), (c,), jnp.float32),
                'var': 0.9 + 0.2 * jax.random.uniform(next(keys), (c,), jnp.float32)}

    p = {'conv1': conv_w(64, 3, 7, 7), 'bn1': bn_p(64)}
    layer1 = []
    inplanes = 64
    for i in range(3):
        blk = {'conv1': conv_w(64, inplanes, 1, 1), 'bn1': bn_p(64),
               'conv2': conv_w(64, 64, 3, 3), 'bn2': bn_p(64),
               'conv3': conv_w(256, 64, 1, 1), 'bn3': bn_p(256)}
        if i == 0:
            blk['down'] = conv_w(256, inplanes, 1, 1)
            blk['bnd'] = bn_p(256)
        layer1.append(blk)
        inplanes = 256
    p['layer1'] = layer1
    p['fc_w'] = jax.random.normal(next(keys), (256, 1), jnp.float32) * 0.05
    p['fc_b'] = jnp.zeros((1,), jnp.float32)
    return p


# ----------------------------------------------------------------------------
if __name__ == "__main__":
    key = jax.random.PRNGKey(0)
    k_param, k_img = jax.random.split(key)

    params = prepare_params(init_params(k_param))       # BN folding / layout once
    image = jax.random.normal(k_img, (2, 3, 32, 32), jnp.float32)   # NCHW, small
    label = jnp.array([0.0, 1.0], jnp.float32)

    # forward with label -> training dict
    out = npr_model_forward(params, image, label)
    jax.block_until_ready(out['backward_loss'])
    jax.block_until_ready(out['pred_label'])

    # forward without label -> hidden features (B, 256)
    hidden = npr_model_forward(params, image, None)
    jax.block_until_ready(hidden)

    assert hidden.shape == (2, 256)
    assert out['pred_label'].shape == (2,)
    assert bool(jnp.isfinite(out['backward_loss']))

    print("KERNEL_OK")
</pallas_src>

<mosaic_0001>
module attributes {stable_mosaic.version = 11 : i64} {
  func.func @_matmul_bias_act_kernel(%arg0: i32, %arg1: memref<256x147xf32, #tpu.memory_space<vmem>>, %arg2: memref<147x64xf32, #tpu.memory_space<vmem>>, %arg3: memref<1x64xf32, #tpu.memory_space<vmem>>, %arg4: memref<256x64xf32, #tpu.memory_space<vmem>>) attributes {dimension_semantics = [#tpu.dimension_semantics<parallel>], iteration_bounds = array<i64: 2>, scalar_prefetch = 0 : i64, scratch_operands = 0 : i64, tpu.core_type = #tpu.core_type<tc>, window_params = [{transform_indices = @transform_0, window_bounds = array<i64: 256, 147>}, {pipeline_mode = #tpu.pipeline_mode<synchronous>, transform_indices = @transform_1, window_bounds = array<i64: 147, 64>}, {pipeline_mode = #tpu.pipeline_mode<synchronous>, transform_indices = @transform_2, window_bounds = array<i64: 1, 64>}, {transform_indices = @transform_3, window_bounds = array<i64: 256, 64>}]} {
    %c0 = arith.constant 0 : index
    %c0_0 = arith.constant 0 : index
    %0 = vector.load %arg1[%c0, %c0_0] : memref<256x147xf32, #tpu.memory_space<vmem>>, vector<256x147xf32>
    %c0_1 = arith.constant 0 : index
    %c0_2 = arith.constant 0 : index
    %1 = vector.load %arg2[%c0_1, %c0_2] : memref<147x64xf32, #tpu.memory_space<vmem>>, vector<147x64xf32>
    %cst = arith.constant dense<0.000000e+00> : vector<256x64xf32>
    %2 = tpu.matmul %0, %1, %cst {dimension_numbers = #tpu.dot_dimension_numbers<[1], [0], [0], [1], [0, 0, 1, 1], [], []>} : vector<256x147xf32>, vector<147x64xf32>, vector<256x64xf32> -> vector<256x64xf32>
    %c0_3 = arith.constant 0 : index
    %c0_4 = arith.constant 0 : index
    %3 = vector.load %arg3[%c0_3, %c0_4] : memref<1x64xf32, #tpu.memory_space<vmem>>, vector<1x64xf32>
    %4 = vector.broadcast %3 : vector<1x64xf32> to vector<256x64xf32>
    %5 = arith.addf %2, %4 : vector<256x64xf32>
    %cst_5 = arith.constant 0.000000e+00 : f32
    %6 = vector.broadcast %cst_5 : f32 to vector<256x64xf32>
    %7 = arith.maximumf %5, %6 : vector<256x64xf32>
    %c0_6 = arith.constant 0 : index
    %c0_7 = arith.constant 0 : index
    %8 = vector.load %arg4[%c0_6, %c0_7] : memref<256x64xf32, #tpu.memory_space<vmem>>, vector<256x64xf32>
    tpu.vector_store %arg4[%c0_6, %c0_7], %7 {strides = array<i32>} : memref<256x64xf32, #tpu.memory_space<vmem>>, vector<256x64xf32>,
    return
  }
  func.func @transform_0(%arg0: i32) -> (i32, i32) {
    %c0_i32 = arith.constant 0 : i32
    %c0_i32_0 = arith.constant 0 : i32
    return %arg0, %c0_i32 : i32, i32
  }
  func.func @transform_1(%arg0: i32) -> (i32, i32) {
    %c0_i32 = arith.constant 0 : i32
    %c0_i32_0 = arith.constant 0 : i32
    %c0_i32_1 = arith.constant 0 : i32
    return %c0_i32, %c0_i32_0 : i32, i32
  }
  func.func @transform_2(%arg0: i32) -> (i32, i32) {
    %c0_i32 = arith.constant 0 : i32
    %c0_i32_0 = arith.constant 0 : i32
    %c0_i32_1 = arith.constant 0 : i32
    return %c0_i32, %c0_i32_0 : i32, i32
  }
  func.func @transform_3(%arg0: i32) -> (i32, i32) {
    %c0_i32 = arith.constant 0 : i32
    %c0_i32_0 = arith.constant 0 : i32
    return %arg0, %c0_i32 : i32, i32
  }
}

</mosaic_0001>

<bundles_post_ra>
// kernel: tpu_custom_call.1
= control target key start
LH: loop header
LB: loop body
LE: loop exit
PB: predicated region body
PF: predicated region fallthrough
CT: control target
= control target key end

     0   :  { %s848_s12 = smov 0   ;;  %s1145_s0 = inlined_call_operand.vmem [shape: f32[512,147], index: 0, kind: input, shape index: {}]   ;;  %s1146_s1 = inlined_call_operand.vmem [shape: f32[147,64], index: 1, kind: input, shape index: {}]   ;;  %s1147_s2 = inlined_call_operand.vmem [shape: f32[1,64], index: 2, kind: input, shape index: {}]   ;;  %s1148_s3 = inlined_call_operand.vmem [shape: f32[512,64], index: 3, kind: output, shape index: {}]  }
   0x1 LB: > { %s714_s13 = sadd.s32 4294967295, %s824_s12   ;;  %p718_p0 = scmp.ge.s32.totalorder %s824_s12, 1  ;;  %s824_s12 = sphi %s848_s12, %s13_s12  }
   0x2   : > { %p139_p1 = scmp.lt.s32.totalorder %s824_s12, 3 }
   0x4   : > { %p140_p2 = pnand %p718_p0, %p139_p1 }
   0x5   : > { %v241_v0 = vld [vmem:[%s1146_s1] sm:$0xff] (!%p140_p2)  ;;  %v242_v1 = vld [vmem:[%s1146_s1 + $0x8] sm:$0xff] (!%p140_p2)  ;;  %v243_v2 = vld [vmem:[%s1146_s1 + $0x10] sm:$0xff] (!%p140_p2)  ;;  %v826_v3 = vmov (!%p140_p2), 0.0|0.0   ;;  %s719_s22 = sshll.u32 (!%p140_p2), %s714_s13, 5  ;;  %vm267_vm0 = vcmask (!%p140_p2), 154624  }
   0x6   : > { %143 = sbr.rel (%p140_p2) target bundleno = 322 (0x142), region = 32  ;;  %761 = vmatprep.subr.bf16.mxu0 (!%p140_p2), %v826_v3  ;;  %788 = vmatprep.subr.bf16.mxu1 (!%p140_p2), %v826_v3  ;;  %v762_v4 = vpack.c.bf16 (!%p140_p2), %v242_v1, %v241_v0  ;;  %v244_v5 = vld [vmem:[%s1146_s1 + $0x18] sm:$0xff] (!%p140_p2)  ;;  %p165_p3 = scmp.lt.s32.totalorder (!%p140_p2), %s719_s22, 63  ;;  %v245_v7 = vld [vmem:[%s1146_s1 + $0x20] sm:$0xff] (!%p140_p2)  ;;  %v246_v8 = vld [vmem:[%s1146_s1 + $0x28] sm:$0xff] (!%p140_p2)  ;;  %v827_v30 = vmov (!%p140_p2), 0.0  }
   0x7   : > { %v765_v6 = vpack.c.bf16 (!%p140_p2), %v244_v5, %v243_v2  ;;  %v768_v9 = vpack.c.bf16 (!%p140_p2), %v246_v8, %v245_v7  ;;  %v247_v10 = vld [vmem:[%s1146_s1 + $0x30] sm:$0xff] (!%p140_p2)  ;;  %v248_v11 = vld [vmem:[%s1146_s1 + $0x38] sm:$0xff] (!%p140_p2)  ;;  %v249_v15 = vld [vmem:[%s1146_s1 + $0x40] sm:$0xff] (!%p140_p2)  ;;  %vm364_vm1 = vcmask (!%p140_p2), 1042432   ;;  %vm625_vm2 = vcmask (!%p140_p2), 523264  }
   0x8   : > { %763 = vmatpush1.bf16.msra.mxu0 (!%p140_p2), %v762_v4  ;;  %798 = vmatpush1.bf16.msra.mxu1 (!%p140_p2), %v762_v4  ;;  %v771_v14 = vpack.c.bf16 (!%p140_p2), %v248_v11, %v247_v10  ;;  %v250_v16 = vld [vmem:[%s1146_s1 + $0x48] sm:$0xff] (!%p140_p2)  ;;  %v251_v18 = vld [vmem:[%s1146_s1 + $0x50] sm:$0xff] (!%p140_p2)  ;;  %v252_v19 = vld [vmem:[%s1146_s1 + $0x58] sm:$0xff] (!%p140_p2) }
   0x9   : > { %764 = vmatprep.subr.bf16.mxu0 (!%p140_p2), %v826_v3  ;;  %789 = vmatprep.subr.bf16.mxu1 (!%p140_p2), %v826_v3  ;;  %v774_v17 = vpack.c.bf16 (!%p140_p2), %v250_v16, %v249_v15  ;;  %v777_v20 = vpack.c.bf16 (!%p140_p2), %v252_v19, %v251_v18  ;;  %v253_v21 = vld [vmem:[%s1146_s1 + $0x60] sm:$0xff] (!%p140_p2)  ;;  %v254_v22 = vld [vmem:[%s1146_s1 + $0x68] sm:$0xff] (!%p140_p2)  ;;  %v255_v24 = vld [vmem:[%s1146_s1 + $0x70] sm:$0xff] (!%p140_p2) }
   0xa   : > { %v780_v23 = vpack.c.bf16 (!%p140_p2), %v254_v22, %v253_v21  ;;  %v256_v25 = vld [vmem:[%s1146_s1 + $0x78] sm:$0xff] (!%p140_p2)  ;;  %v257_v27 = vld [vmem:[%s1146_s1 + $0x80] sm:$0xff] (!%p140_p2)  ;;  %v258_v28 = vld [vmem:[%s1146_s1 + $0x88] sm:$0xff] (!%p140_p2) }
   0xb   : > { %v783_v26 = vpack.c.bf16 (!%p140_p2), %v256_v25, %v255_v24  ;;  %v786_v29 = vpack.c.bf16 (!%p140_p2), %v258_v28, %v257_v27  ;;  %v259_v31 = vld [vmem:[%s1146_s1 + $0x90] sm:$0x7] (!%p140_p2) }
   0xc   : > { %766 = vmatpush1.bf16.msra.mxu0 (!%p140_p2), %v765_v6  ;;  %799 = vmatpush1.bf16.msra.mxu1 (!%p140_p2), %v765_v6 }
   0xd   : > { %s1150_s22 = smov (!%p165_p3, %s719_s22), 63  ;;  %767 = vmatprep.subr.bf16.mxu0 %v826_v3  ;;  %790 = vmatprep.subr.bf16.mxu1 %v826_v3 }
   0xe   : > { %s760_s27 = sshll.u32 %s1150_s22, 4  ;;  %s723_s8 = sshll.u32 %s1150_s22, 3 }
   0xf   : > { %s887_s5 = scalar_lea.vmem %s1145_s0, %s760_s27 }
  0x10   : > { %v178_v12 = vld [vmem:[%s887_s5 + $0x8] sm:$0xff]  ;;  %769 = vmatpush1.bf16.msra.mxu0 %v768_v9  ;;  %800 = vmatpush1.bf16.msra.mxu1 %v768_v9  ;;  %v177_v32 = vld [vmem:[%s887_s5] sm:$0xff]  ;;  %v180_v34 = vld [vmem:[%s887_s5 + $0x18] sm:$0xff] }
  0x11   : > { %v210_v13 = vld [vmem:[%s887_s5 + $0x108] sm:$0xff]  ;;  %726 = vmatprep.mubr.msk.f32.mxu0 %vm267_vm0, %v178_v12  ;;  %770 = vmatprep.subr.bf16.mxu0 %v826_v3  ;;  %v209_v33 = vld [vmem:[%s887_s5 + $0x100] sm:$0xff]  ;;  %v212_v35 = vld [vmem:[%s887_s5 + $0x118] sm:$0xff] }
  0x12   : > { %742 = vmatprep.mubr.msk.f32.mxu1 %vm267_vm0, %v210_v13  ;;  %791 = vmatprep.subr.bf16.mxu1 %v826_v3  ;;  %v179_v36 = vld [vmem:[%s887_s5 + $0x10] sm:$0xff]  ;;  %v182_v38 = vld [vmem:[%s887_s5 + $0x28] sm:$0xff]  ;;  %v181_v40 = vld [vmem:[%s887_s5 + $0x20] sm:$0xff] }
  0x13   : > { %v211_v37 = vld [vmem:[%s887_s5 + $0x110] sm:$0xff]  ;;  %v214_v39 = vld [vmem:[%s887_s5 + $0x128] sm:$0xff]  ;;  %v213_v41 = vld [vmem:[%s887_s5 + $0x120] sm:$0xff] }
  0x14   : > { %772 = vmatpush1.bf16.msra.mxu0 %v771_v14  ;;  %801 = vmatpush1.bf16.msra.mxu1 %v771_v14  ;;  %v184_v42 = vld [vmem:[%s887_s5 + $0x38] sm:$0xff]  ;;  %v183_v44 = vld [vmem:[%s887_s5 + $0x30] sm:$0xff]  ;;  %v186_v46 = vld [vmem:[%s887_s5 + $0x48] sm:$0xff] }
  0x15   : > { %773 = vmatprep.subr.bf16.mxu0 %v826_v3  ;;  %792 = vmatprep.subr.bf16.mxu1 %v826_v3  ;;  %v216_v43 = vld [vmem:[%s887_s5 + $0x138] sm:$0xff]  ;;  %v215_v45 = vld [vmem:[%s887_s5 + $0x130] sm:$0xff]  ;;  %v218_v47 = vld [vmem:[%s887_s5 + $0x148] sm:$0xff] }
  0x16   : > { %v185_v48 = vld [vmem:[%s887_s5 + $0x40] sm:$0xff]  ;;  %v188_v50 = vld [vmem:[%s887_s5 + $0x58] sm:$0xff]  ;;  %v187_v52 = vld [vmem:[%s887_s5 + $0x50] sm:$0xff] }
  0x17   : > { %v217_v49 = vld [vmem:[%s887_s5 + $0x140] sm:$0xff]  ;;  %v220_v51 = vld [vmem:[%s887_s5 + $0x158] sm:$0xff]  ;;  %v219_v53 = vld [vmem:[%s887_s5 + $0x150] sm:$0xff] }
  0x18   : > { %775 = vmatpush1.bf16.msra.mxu0 %v774_v17  ;;  %802 = vmatpush1.bf16.msra.mxu1 %v774_v17  ;;  %v190_v54 = vld [vmem:[%s887_s5 + $0x68] sm:$0xff]  ;;  %v189_v56 = vld [vmem:[%s887_s5 + $0x60] sm:$0xff]  ;;  %v192_v58 = vld [vmem:[%s887_s5 + $0x78] sm:$0xff] }
  0x19   : > { %776 = vmatprep.subr.bf16.mxu0 %v826_v3  ;;  %793 = vmatprep.subr.bf16.mxu1 %v826_v3  ;;  %v222_v55 = vld [vmem:[%s887_s5 + $0x168] sm:$0xff]  ;;  %v221_v57 = vld [vmem:[%s887_s5 + $0x160] sm:$0xff]  ;;  %v224_v59 = vld [vmem:[%s887_s5 + $0x178] sm:$0xff] }
  0x1a   : > { %v191_v60 = vld [vmem:[%s887_s5 + $0x70] sm:$0xff]  ;;  %v194_v62 = vld [vmem:[%s887_s5 + $0x88] sm:$0xff]  ;;  %v193_v0 = vld [vmem:[%s887_s5 + $0x80] sm:$0xff] }
  0x1b   : > { %v223_v61 = vld [vmem:[%s887_s5 + $0x170] sm:$0xff]  ;;  %v226_v63 = vld [vmem:[%s887_s5 + $0x188] sm:$0xff]  ;;  %v225_v1 = vld [vmem:[%s887_s5 + $0x180] sm:$0xff] }
  0x1c   : > { %778 = vmatpush1.bf16.msra.mxu0 %v777_v20  ;;  %803 = vmatpush1.bf16.msra.mxu1 %v777_v20  ;;  %v196_v2 = vld [vmem:[%s887_s5 + $0x98] sm:$0xff]  ;;  %v195_v4 = vld [vmem:[%s887_s5 + $0x90] sm:$0xff]  ;;  %v198_v6 = vld [vmem:[%s887_s5 + $0xa8] sm:$0xff] }
  0x1d   : > { %779 = vmatprep.subr.bf16.mxu0 %v826_v3  ;;  %794 = vmatprep.subr.bf16.mxu1 %v826_v3  ;;  %v227_v5 = vld [vmem:[%s887_s5 + $0x190] sm:$0xff]  ;;  %v230_v7 = vld [vmem:[%s887_s5 + $0x1a8] sm:$0xff]  ;;  %v197_v8 = vld [vmem:[%s887_s5 + $0xa0] sm:$0xff] }
  0x1e   : > { %v229_v9 = vld [vmem:[%s887_s5 + $0x1a0] sm:$0xff]  ;;  %v200_v10 = vld [vmem:[%s887_s5 + $0xb8] sm:$0xff]  ;;  %v199_v12 = vld [vmem:[%s887_s5 + $0xb0] sm:$0xff] }
  0x1f   : > { %v232_v11 = vld [vmem:[%s887_s5 + $0x1b8] sm:$0xff]  ;;  %v231_v13 = vld [vmem:[%s887_s5 + $0x1b0] sm:$0xff]  ;;  %v202_v14 = vld [vmem:[%s887_s5 + $0xc8] sm:$0xff] }
  0x20   : > { %781 = vmatpush1.bf16.msra.mxu0 %v780_v23  ;;  %804 = vmatpush1.bf16.msra.mxu1 %v780_v23  ;;  %v234_v15 = vld [vmem:[%s887_s5 + $0x1c8] sm:$0xff]  ;;  %v201_v16 = vld [vmem:[%s887_s5 + $0xc0] sm:$0xff]  ;;  %v204_v18 = vld [vmem:[%s887_s5 + $0xd8] sm:$0xff] }
  0x21   : > { %782 = vmatprep.subr.bf16.mxu0 %v826_v3  ;;  %795 = vmatprep.subr.bf16.mxu1 %v826_v3  ;;  %v233_v17 = vld [vmem:[%s887_s5 + $0x1c0] sm:$0xff]  ;;  %v236_v19 = vld [vmem:[%s887_s5 + $0x1d8] sm:$0xff]  ;;  %v203_v20 = vld [vmem:[%s887_s5 + $0xd0] sm:$0xff] }
  0x22   : > { %v235_v21 = vld [vmem:[%s887_s5 + $0x1d0] sm:$0xff]  ;;  %v206_v22 = vld [vmem:[%s887_s5 + $0xe8] sm:$0xff]  ;;  %v205_v24 = vld [vmem:[%s887_s5 + $0xe0] sm:$0xff] }
  0x23   : > { %v238_v23 = vld [vmem:[%s887_s5 + $0x1e8] sm:$0xff]  ;;  %v237_v25 = vld [vmem:[%s887_s5 + $0x1e0] sm:$0xff]  ;;  %v240_v27 = vld [vmem:[%s887_s5 + $0x1f8] sm:$0xff] }
  0x24   : > { %784 = vmatpush1.bf16.msra.mxu0 %v783_v26  ;;  %805 = vmatpush1.bf16.msra.mxu1 %v783_v26  ;;  %v208_v26 = vld [vmem:[%s887_s5 + $0xf8] sm:$0xff]  ;;  %v207_v28 = vld [vmem:[%s887_s5 + $0xf0] sm:$0xff] }
  0x25   : > { %785 = vmatprep.subr.bf16.mxu0 %v826_v3  ;;  %796 = vmatprep.subr.bf16.mxu1 %v826_v3  ;;  %v228_v3 = vld [vmem:[%s887_s5 + $0x198] sm:$0xff] }
  0x28   : > { %787 = vmatpush1.bf16.msra.mxu0 %v786_v29  ;;  %806 = vmatpush1.bf16.msra.mxu1 %v786_v29  ;;  %v239_v29 = vld [vmem:[%s887_s5 + $0x1f0] sm:$0xff]  ;;  %s1046_s5 = scalar_lea.vmem %s1148_s3, %s723_s8 }
  0x29   : > { %404 = vmatprep.subr.mxu0 %v827_v30  ;;  %797 = vmatprep.subr.mxu1 %v827_v30  ;;  %v1038_v30 = vld [vmem:[%s1147_s2] ss:$0 sm:$0xff] }
  0x2c   : > { %725 = vmatpush1.msk.msra.mxu0 %vm364_vm1, %v259_v31  ;;  %807 = vmatpush1.msk.msra.mxu1 %vm364_vm1, %v259_v31 }
  0x2d   : > { %433 = vmatmul.mubr.f32.vlgmr.msra.gmra.mrb[0].mxu0 %v177_v32  ;;  %513 = vmatmul.mubr.f32.vlgmr.msra.gmra.mrb[0].mxu1 %v209_v33 }
  0x2e   : > { %727 = vmatprep.mubr.msk.f32.mxu0 %vm267_vm0, %v180_v34  ;;  %743 = vmatprep.mubr.msk.f32.mxu1 %vm267_vm0, %v212_v35 }
  0x31   : > { %438 = vmatmul.mubr.f32.gmra.mrb[2].mxu0 %v179_v36  ;;  %518 = vmatmul.mubr.f32.gmra.mrb[2].mxu1 %v211_v37 }
  0x32   : > { %728 = vmatprep.mubr.msk.f32.mxu0 %vm267_vm0, %v182_v38  ;;  %744 = vmatprep.mubr.msk.f32.mxu1 %vm267_vm0, %v214_v39 }
  0x35   : > { %443 = vmatmul.mubr.f32.gmra.mrb[4].mxu0 %v181_v40  ;;  %523 = vmatmul.mubr.f32.gmra.mrb[4].mxu1 %v213_v41 }
  0x36   : > { %729 = vmatprep.mubr.msk.f32.mxu0 %vm267_vm0, %v184_v42  ;;  %745 = vmatprep.mubr.msk.f32.mxu1 %vm267_vm0, %v216_v43 }
  0x39   : > { %448 = vmatmul.mubr.f32.gmra.mrb[6].mxu0 %v183_v44  ;;  %528 = vmatmul.mubr.f32.gmra.mrb[6].mxu1 %v215_v45 }
  0x3a   : > { %730 = vmatprep.mubr.msk.f32.mxu0 %vm267_vm0, %v186_v46  ;;  %746 = vmatprep.mubr.msk.f32.mxu1 %vm267_vm0, %v218_v47 }
  0x3d   : > { %453 = vmatmul.mubr.f32.gmra.mrb[8].mxu0 %v185_v48  ;;  %533 = vmatmul.mubr.f32.gmra.mrb[8].mxu1 %v217_v49 }
  0x3e   : > { %731 = vmatprep.mubr.msk.f32.mxu0 %vm267_vm0, %v188_v50  ;;  %747 = vmatprep.mubr.msk.f32.mxu1 %vm267_vm0, %v220_v51 }
  0x41   : > { %458 = vmatmul.mubr.f32.gmra.mrb[10].mxu0 %v187_v52  ;;  %538 = vmatmul.mubr.f32.gmra.mrb[10].mxu1 %v219_v53 }
  0x42   : > { %732 = vmatprep.mubr.msk.f32.mxu0 %vm267_vm0, %v190_v54  ;;  %748 = vmatprep.mubr.msk.f32.mxu1 %vm267_vm0, %v222_v55 }
  0x45   : > { %463 = vmatmul.mubr.f32.gmra.mrb[12].mxu0 %v189_v56  ;;  %543 = vmatmul.mubr.f32.gmra.mrb[12].mxu1 %v221_v57 }
  0x46   : > { %733 = vmatprep.mubr.msk.f32.mxu0 %vm267_vm0, %v192_v58  ;;  %749 = vmatprep.mubr.msk.f32.mxu1 %vm267_vm0, %v224_v59 }
  0x49   : > { %468 = vmatmul.mubr.f32.gmra.mrb[14].mxu0 %v191_v60  ;;  %548 = vmatmul.mubr.f32.gmra.mrb[14].mxu1 %v223_v61 }
  0x4a   : > { %734 = vmatprep.mubr.msk.f32.mxu0 %vm267_vm0, %v194_v62  ;;  %750 = vmatprep.mubr.msk.f32.mxu1 %vm267_vm0, %v226_v63 }
  0x4d   : > { %473 = vmatmul.mubr.f32.gmra.mrb[16].mxu0 %v193_v0  ;;  %553 = vmatmul.mubr.f32.gmra.mrb[16].mxu1 %v225_v1 }
  0x4e   : > { %735 = vmatprep.mubr.msk.f32.mxu0 %vm267_vm0, %v196_v2  ;;  %751 = vmatprep.mubr.msk.f32.mxu1 %vm267_vm0, %v228_v3 }
  0x51   : > { %478 = vmatmul.mubr.f32.gmra.mrb[18].mxu0 %v195_v4  ;;  %558 = vmatmul.mubr.f32.gmra.mrb[18].mxu1 %v227_v5 }
  0x52   : > { %736 = vmatprep.mubr.msk.f32.mxu0 %vm267_vm0, %v198_v6  ;;  %752 = vmatprep.mubr.msk.f32.mxu1 %vm267_vm0, %v230_v7 }
  0x55   : > { %483 = vmatmul.mubr.f32.gmra.mrb[20].mxu0 %v197_v8  ;;  %563 = vmatmul.mubr.f32.gmra.mrb[20].mxu1 %v229_v9 }
  0x56   : > { %737 = vmatprep.mubr.msk.f32.mxu0 %vm267_vm0, %v200_v10  ;;  %753 = vmatprep.mubr.msk.f32.mxu1 %vm267_vm0, %v232_v11 }
  0x59   : > { %488 = vmatmul.mubr.f32.gmra.mrb[22].mxu0 %v199_v12  ;;  %568 = vmatmul.mubr.f32.gmra.mrb[22].mxu1 %v231_v13 }
  0x5a   : > { %738 = vmatprep.mubr.msk.f32.mxu0 %vm267_vm0, %v202_v14  ;;  %754 = vmatprep.mubr.msk.f32.mxu1 %vm267_vm0, %v234_v15 }
  0x5d   : > { %493 = vmatmul.mubr.f32.gmra.mrb[24].mxu0 %v201_v16  ;;  %573 = vmatmul.mubr.f32.gmra.mrb[24].mxu1 %v233_v17 }
  0x5e   : > { %739 = vmatprep.mubr.msk.f32.mxu0 %vm267_vm0, %v204_v18  ;;  %755 = vmatprep.mubr.msk.f32.mxu1 %vm267_vm0, %v236_v19 }
  0x61   : > { %498 = vmatmul.mubr.f32.gmra.mrb[26].mxu0 %v203_v20  ;;  %578 = vmatmul.mubr.f32.gmra.mrb[26].mxu1 %v235_v21 }
  0x62   : > { %740 = vmatprep.mubr.msk.f32.mxu0 %vm267_vm0, %v206_v22  ;;  %756 = vmatprep.mubr.msk.f32.mxu1 %vm267_vm0, %v238_v23 }
  0x65   : > { %503 = vmatmul.mubr.f32.gmra.mrb[28].mxu0 %v205_v24  ;;  %583 = vmatmul.mubr.f32.gmra.mrb[28].mxu1 %v237_v25 }
  0x66   : > { %741 = vmatprep.mubr.msk.f32.mxu0 %vm267_vm0, %v208_v26  ;;  %757 = vmatprep.mubr.msk.f32.mxu1 %vm267_vm0, %v240_v27 }
  0x69   : > { %508 = vmatmul.mubr.f32.gmra.mrb[30].mxu0 %v207_v28  ;;  %588 = vmatmul.mubr.f32.gmra.mrb[30].mxu1 %v239_v29 }
 0x100   : > { %v434_v31 = vpop.f32.mrb[0].mxu0  ;;  %v514_v32 = vpop.f32.mrb[0].mxu1 }
 0x101   : > { %v435_v33 = vadd.f32 %v1038_v30, %v434_v31  ;;  %v515_v34 = vadd.f32 %v1038_v30, %v514_v32  ;;  %v436_v35 = vpop.f32.mrb[1].mxu0  ;;  %v516_v36 = vpop.f32.mrb[1].mxu1 }
 0x103   : > { %v593_v37 = vmax.f32 %v435_v33, 0.0  ;;  %v609_v38 = vmax.f32 %v515_v34, 0.0 }
 0x104   : > { %v439_v39 = vpop.f32.mrb[2].mxu0  ;;  %v519_v40 = vpop.f32.mrb[2].mxu1 }
 0x105   : > { %626 = vst.msk [vmem:[%s1046_s5] sm:$0xff] %vm625_vm2, %v593_v37  ;;  %642 = vst.msk [vmem:[%s1046_s5 + $0x80] sm:$0xff] %vm625_vm2, %v609_v38  ;;  %v440_v41 = vadd.f32 %v1038_v30, %v439_v39  ;;  %v520_v42 = vadd.f32 %v1038_v30, %v519_v40  ;;  %v441_v43 = vpop.f32.mrb[3].mxu0  ;;  %v521_v44 = vpop.f32.mrb[3].mxu1 }
 0x107   : > { %v594_v45 = vmax.f32 %v440_v41, 0.0  ;;  %v610_v46 = vmax.f32 %v520_v42, 0.0 }
 0x108   : > { %v444_v47 = vpop.f32.mrb[4].mxu0  ;;  %v524_v48 = vpop.f32.mrb[4].mxu1 }
 0x109   : > { %627 = vst.msk [vmem:[%s1046_s5 + $0x8] sm:$0xff] %vm625_vm2, %v594_v45  ;;  %643 = vst.msk [vmem:[%s1046_s5 + $0x88] sm:$0xff] %vm625_vm2, %v610_v46  ;;  %v445_v49 = vadd.f32 %v1038_v30, %v444_v47  ;;  %v525_v50 = vadd.f32 %v1038_v30, %v524_v48  ;;  %v446_v51 = vpop.f32.mrb[5].mxu0  ;;  %v526_v52 = vpop.f32.mrb[5].mxu1 }
 0x10b   : > { %v595_v53 = vmax.f32 %v445_v49, 0.0  ;;  %v611_v54 = vmax.f32 %v525_v50, 0.0 }
 0x10c   : > { %v449_v55 = vpop.f32.mrb[6].mxu0  ;;  %v529_v56 = vpop.f32.mrb[6].mxu1 }
 0x10d   : > { %628 = vst.msk [vmem:[%s1046_s5 + $0x10] sm:$0xff] %vm625_vm2, %v595_v53  ;;  %644 = vst.msk [vmem:[%s1046_s5 + $0x90] sm:$0xff] %vm625_vm2, %v611_v54  ;;  %v450_v57 = vadd.f32 %v1038_v30, %v449_v55  ;;  %v530_v58 = vadd.f32 %v1038_v30, %v529_v56  ;;  %v451_v59 = vpop.f32.mrb[7].mxu0  ;;  %v531_v60 = vpop.f32.mrb[7].mxu1 }
 0x10f   : > { %v596_v61 = vmax.f32 %v450_v57, 0.0  ;;  %v612_v62 = vmax.f32 %v530_v58, 0.0 }
 0x110   : > { %v454_v63 = vpop.f32.mrb[8].mxu0  ;;  %v534_v0 = vpop.f32.mrb[8].mxu1 }
 0x111   : > { %629 = vst.msk [vmem:[%s1046_s5 + $0x18] sm:$0xff] %vm625_vm2, %v596_v61  ;;  %645 = vst.msk [vmem:[%s1046_s5 + $0x98] sm:$0xff] %vm625_vm2, %v612_v62  ;;  %v455_v1 = vadd.f32 %v1038_v30, %v454_v63  ;;  %v535_v2 = vadd.f32 %v1038_v30, %v534_v0  ;;  %v456_v3 = vpop.f32.mrb[9].mxu0  ;;  %v536_v4 = vpop.f32.mrb[9].mxu1 }
 0x113   : > { %v597_v5 = vmax.f32 %v455_v1, 0.0  ;;  %v613_v6 = vmax.f32 %v535_v2, 0.0 }
 0x114   : > { %v459_v7 = vpop.f32.mrb[10].mxu0  ;;  %v539_v8 = vpop.f32.mrb[10].mxu1 }
 0x115   : > { %630 = vst.msk [vmem:[%s1046_s5 + $0x20] sm:$0xff] %vm625_vm2, %v597_v5  ;;  %646 = vst.msk [vmem:[%s1046_s5 + $0xa0] sm:$0xff] %vm625_vm2, %v613_v6  ;;  %v460_v9 = vadd.f32 %v1038_v30, %v459_v7  ;;  %v540_v10 = vadd.f32 %v1038_v30, %v539_v8  ;;  %v461_v11 = vpop.f32.mrb[11].mxu0  ;;  %v541_v12 = vpop.f32.mrb[11].mxu1 }
 0x117   : > { %v598_v13 = vmax.f32 %v460_v9, 0.0  ;;  %v614_v14 = vmax.f32 %v540_v10, 0.0 }
 0x118   : > { %v464_v15 = vpop.f32.mrb[12].mxu0  ;;  %v544_v16 = vpop.f32.mrb[12].mxu1 }
 0x119   : > { %631 = vst.msk [vmem:[%s1046_s5 + $0x28] sm:$0xff] %vm625_vm2, %v598_v13  ;;  %647 = vst.msk [vmem:[%s1046_s5 + $0xa8] sm:$0xff] %vm625_vm2, %v614_v14  ;;  %v465_v17 = vadd.f32 %v1038_v30, %v464_v15  ;;  %v545_v18 = vadd.f32 %v1038_v30, %v544_v16  ;;  %v466_v19 = vpop.f32.mrb[13].mxu0  ;;  %v546_v20 = vpop.f32.mrb[13].mxu1 }
 0x11b   : > { %v599_v21 = vmax.f32 %v465_v17, 0.0  ;;  %v615_v22 = vmax.f32 %v545_v18, 0.0 }
 0x11c   : > { %v469_v23 = vpop.f32.mrb[14].mxu0  ;;  %v549_v24 = vpop.f32.mrb[14].mxu1 }
 0x11d   : > { %632 = vst.msk [vmem:[%s1046_s5 + $0x30] sm:$0xff] %vm625_vm2, %v599_v21  ;;  %648 = vst.msk [vmem:[%s1046_s5 + $0xb0] sm:$0xff] %vm625_vm2, %v615_v22  ;;  %v470_v25 = vadd.f32 %v1038_v30, %v469_v23  ;;  %v550_v26 = vadd.f32 %v1038_v30, %v549_v24  ;;  %v471_v27 = vpop.f32.mrb[15].mxu0  ;;  %v551_v28 = vpop.f32.mrb[15].mxu1 }
 0x11f   : > { %v600_v29 = vmax.f32 %v470_v25, 0.0  ;;  %v616_v31 = vmax.f32 %v550_v26, 0.0 }
 0x120   : > { %v474_v32 = vpop.f32.mrb[16].mxu0  ;;  %v554_v33 = vpop.f32.mrb[16].mxu1 }
 0x121   : > { %633 = vst.msk [vmem:[%s1046_s5 + $0x38] sm:$0xff] %vm625_vm2, %v600_v29  ;;  %649 = vst.msk [vmem:[%s1046_s5 + $0xb8] sm:$0xff] %vm625_vm2, %v616_v31  ;;  %v475_v34 = vadd.f32 %v1038_v30, %v474_v32  ;;  %v555_v35 = vadd.f32 %v1038_v30, %v554_v33  ;;  %v476_v36 = vpop.f32.mrb[17].mxu0  ;;  %v556_v37 = vpop.f32.mrb[17].mxu1 }
 0x123   : > { %v601_v38 = vmax.f32 %v475_v34, 0.0  ;;  %v617_v39 = vmax.f32 %v555_v35, 0.0 }
 0x124   : > { %v479_v40 = vpop.f32.mrb[18].mxu0  ;;  %v559_v41 = vpop.f32.mrb[18].mxu1 }
 0x125   : > { %634 = vst.msk [vmem:[%s1046_s5 + $0x40] sm:$0xff] %vm625_vm2, %v601_v38  ;;  %650 = vst.msk [vmem:[%s1046_s5 + $0xc0] sm:$0xff] %vm625_vm2, %v617_v39  ;;  %v480_v42 = vadd.f32 %v1038_v30, %v479_v40  ;;  %v560_v43 = vadd.f32 %v1038_v30, %v559_v41  ;;  %v481_v44 = vpop.f32.mrb[19].mxu0  ;;  %v561_v45 = vpop.f32.mrb[19].mxu1 }
 0x127   : > { %v602_v46 = vmax.f32 %v480_v42, 0.0  ;;  %v618_v47 = vmax.f32 %v560_v43, 0.0 }
 0x128   : > { %v484_v48 = vpop.f32.mrb[20].mxu0  ;;  %v564_v49 = vpop.f32.mrb[20].mxu1 }
 0x129   : > { %635 = vst.msk [vmem:[%s1046_s5 + $0x48] sm:$0xff] %vm625_vm2, %v602_v46  ;;  %651 = vst.msk [vmem:[%s1046_s5 + $0xc8] sm:$0xff] %vm625_vm2, %v618_v47  ;;  %v485_v50 = vadd.f32 %v1038_v30, %v484_v48  ;;  %v565_v51 = vadd.f32 %v1038_v30, %v564_v49  ;;  %v486_v52 = vpop.f32.mrb[21].mxu0  ;;  %v566_v53 = vpop.f32.mrb[21].mxu1 }
 0x12b   : > { %v603_v54 = vmax.f32 %v485_v50, 0.0  ;;  %v619_v55 = vmax.f32 %v565_v51, 0.0 }
 0x12c   : > { %v489_v56 = vpop.f32.mrb[22].mxu0  ;;  %v569_v57 = vpop.f32.mrb[22].mxu1 }
 0x12d   : > { %636 = vst.msk [vmem:[%s1046_s5 + $0x50] sm:$0xff] %vm625_vm2, %v603_v54  ;;  %652 = vst.msk [vmem:[%s1046_s5 + $0xd0] sm:$0xff] %vm625_vm2, %v619_v55  ;;  %v490_v58 = vadd.f32 %v1038_v30, %v489_v56  ;;  %v570_v59 = vadd.f32 %v1038_v30, %v569_v57  ;;  %v491_v60 = vpop.f32.mrb[23].mxu0  ;;  %v571_v61 = vpop.f32.mrb[23].mxu1 }
 0x12f   : > { %v604_v62 = vmax.f32 %v490_v58, 0.0  ;;  %v620_v63 = vmax.f32 %v570_v59, 0.0 }
 0x130   : > { %v494_v0 = vpop.f32.mrb[24].mxu0  ;;  %v574_v1 = vpop.f32.mrb[24].mxu1 }
 0x131   : > { %637 = vst.msk [vmem:[%s1046_s5 + $0x58] sm:$0xff] %vm625_vm2, %v604_v62  ;;  %653 = vst.msk [vmem:[%s1046_s5 + $0xd8] sm:$0xff] %vm625_vm2, %v620_v63  ;;  %v495_v2 = vadd.f32 %v1038_v30, %v494_v0  ;;  %v575_v3 = vadd.f32 %v1038_v30, %v574_v1  ;;  %v496_v4 = vpop.f32.mrb[25].mxu0  ;;  %v576_v5 = vpop.f32.mrb[25].mxu1 }
 0x133   : > { %v605_v6 = vmax.f32 %v495_v2, 0.0  ;;  %v621_v7 = vmax.f32 %v575_v3, 0.0 }
 0x134   : > { %v499_v8 = vpop.f32.mrb[26].mxu0  ;;  %v579_v9 = vpop.f32.mrb[26].mxu1 }
 0x135   : > { %638 = vst.msk [vmem:[%s1046_s5 + $0x60] sm:$0xff] %vm625_vm2, %v605_v6  ;;  %654 = vst.msk [vmem:[%s1046_s5 + $0xe0] sm:$0xff] %vm625_vm2, %v621_v7  ;;  %v500_v10 = vadd.f32 %v1038_v30, %v499_v8  ;;  %v580_v11 = vadd.f32 %v1038_v30, %v579_v9  ;;  %v501_v12 = vpop.f32.mrb[27].mxu0  ;;  %v581_v13 = vpop.f32.mrb[27].mxu1 }
 0x137   : > { %v606_v14 = vmax.f32 %v500_v10, 0.0  ;;  %v622_v15 = vmax.f32 %v580_v11, 0.0 }
 0x138   : > { %v504_v16 = vpop.f32.mrb[28].mxu0  ;;  %v584_v17 = vpop.f32.mrb[28].mxu1 }
 0x139   : > { %639 = vst.msk [vmem:[%s1046_s5 + $0x68] sm:$0xff] %vm625_vm2, %v606_v14  ;;  %655 = vst.msk [vmem:[%s1046_s5 + $0xe8] sm:$0xff] %vm625_vm2, %v622_v15  ;;  %v505_v18 = vadd.f32 %v1038_v30, %v504_v16  ;;  %v585_v19 = vadd.f32 %v1038_v30, %v584_v17  ;;  %v506_v20 = vpop.f32.mrb[29].mxu0  ;;  %v586_v21 = vpop.f32.mrb[29].mxu1 }
 0x13b   : > { %v607_v22 = vmax.f32 %v505_v18, 0.0  ;;  %v623_v23 = vmax.f32 %v585_v19, 0.0 }
 0x13c   : > { %v509_v24 = vpop.f32.mrb[30].mxu0  ;;  %v589_v25 = vpop.f32.mrb[30].mxu1 }
 0x13d   : > { %640 = vst.msk [vmem:[%s1046_s5 + $0x70] sm:$0xff] %vm625_vm2, %v607_v22  ;;  %656 = vst.msk [vmem:[%s1046_s5 + $0xf0] sm:$0xff] %vm625_vm2, %v623_v23  ;;  %v510_v26 = vadd.f32 %v1038_v30, %v509_v24  ;;  %v590_v27 = vadd.f32 %v1038_v30, %v589_v25  ;;  %v511_v28 = vpop.f32.mrb[31].mxu0  ;;  %v591_v29 = vpop.f32.mrb[31].mxu1 }
 0x13f   : > { %v608_v31 = vmax.f32 %v510_v26, 0.0  ;;  %v624_v32 = vmax.f32 %v590_v27, 0.0 }
 0x141   : > { %641 = vst.msk [vmem:[%s1046_s5 + $0x78] sm:$0xff] %vm625_vm2, %v608_v31  ;;  %657 = vst.msk [vmem:[%s1046_s5 + $0xf8] sm:$0xff] %vm625_vm2, %v624_v32 }
 0x142 PF: > { %s13_s12 = sadd.s32 1, %s824_s12  }
 0x143   : > { %p10_p4 = scmp.ge.s32.totalorder %s13_s12, 4  }
 0x145   :  { %12 = sbr.rel (!%p10_p4) target bundleno = 1 (0x1), region = 62 }

</bundles_post_ra>
